<compile_context>
chip_gen: v5e
topology: v5e:2x2
jax: 0.10.0
libtpu: 0.0.40
codegen_flags: <defaults>
</compile_context>

<pallas_src>
import functools

import jax
import jax.numpy as jnp
from jax.experimental import pallas as pl
from jax.experimental.pallas import tpu as pltpu

LANE = 128  # TPU lane width


def dqn_kernel(x_ref, w1_ref, b1_ref, w2_ref, b2_ref, o_ref):
    # Layer 1: (TM, in) @ (in, Hp) on the MXU, f32 accumulate; tanh on the EUP.
    h = jnp.dot(x_ref[...], w1_ref[...], preferred_element_type=jnp.float32)
    h = jnp.tanh(h + b1_ref[...])
    # Layer 2: (TM, Hp) @ (Hp, Op) on the MXU; lane-dense (Op = 128) store.
    logits = jnp.dot(h, w2_ref[...], preferred_element_type=jnp.float32) + b2_ref[...]
    o_ref[...] = logits.astype(o_ref.dtype)


def _round_up(n, m):
    return ((n + m - 1) // m) * m


def pad_params(w1, b1, w2, b2):
    """Lane-pad hidden/out dims to 128 ONCE at init; cache + reuse the result.

    Exact: padded hidden lanes are tanh(0)=0 and hit zero rows of W2; padded
    output columns are 0*h + 0 bias = exactly 0.
    """
    in_dim, hidden = w1.shape
    out_dim = w2.shape[1]
    hp = _round_up(hidden, LANE)
    op = _round_up(out_dim, LANE)
    w1p = jnp.pad(w1, ((0, 0), (0, hp - hidden)))
    b1p = jnp.pad(b1.reshape(1, -1), ((0, 0), (0, hp - hidden)))
    w2p = jnp.pad(w2, ((0, hp - hidden), (0, op - out_dim)))
    b2p = jnp.pad(b2.reshape(1, -1), ((0, 0), (0, op - out_dim)))
    return w1p, b1p, w2p, b2p


def _tensorcores_per_chip():
    """Best-effort TC-per-chip query; falls back to 1 (single-step grid)."""
    try:
        info = pltpu.get_tpu_info()
        for name in ("num_cores", "tensorcores_per_chip", "cores_per_chip"):
            n = getattr(info, name, None)
            if isinstance(n, int) and n > 0:
                return n
    except Exception:
        pass
    return 1


def choose_tm(batch, max_tm=1024):
    """Generation-aware batch tile.

    * 1-TC chips (v5e/v6e): one grid step (tm = batch) — per-step overhead
      (~0.35 us) dominates this tiny workload, so fewer steps is better.
    * multi-TC chips (v7x): even grid (>= num TCs) so the "parallel" batch
      axis is sharded across both TensorCores.
    * Cap tm so double-buffered (tm, 128) f32 x/out tiles stay ~1 MiB — far
      under v5e's 16 MiB scoped-VMEM default; no vmem_limit_bytes needed.
    """
    n_tc = _tensorcores_per_chip()
    tm = batch
    if n_tc > 1 and batch % n_tc == 0 and (batch // n_tc) % 8 == 0:
        tm = batch // n_tc
    while tm > max_tm and tm % 2 == 0 and (tm // 2) % 8 == 0:
        tm //= 2
    if tm != batch and (tm % 8 != 0 or batch % tm != 0):
        tm = batch  # fall back to a single full-batch tile
    return tm


@functools.partial(jax.jit, static_argnames=("tm",))
def dqn_forward_padded(x, w1p, b1p, w2p, b2p, *, tm):
    """Batched DQN forward on pre-padded params.

    x:   (B, in_dim)  with tm | B
    w1p: (in_dim, Hp)  b1p: (1, Hp)   (Hp = hidden rounded up to 128)
    w2p: (Hp, Op)      b2p: (1, Op)   (Op = out_dim rounded up to 128)

    Returns (B, Op); columns >= out_dim are exactly zero (mask or slice lazily
    downstream — no copy is issued here).
    """
    B, in_dim = x.shape
    hp = w1p.shape[1]
    op = w2p.shape[1]
    if B % tm != 0:
        raise ValueError(f"batch {B} must be divisible by tm {tm}")

    return pl.pallas_call(
        dqn_kernel,
        out_shape=jax.ShapeDtypeStruct((B, op), x.dtype),
        grid_spec=pltpu.PrefetchScalarGridSpec(
            num_scalar_prefetch=0,
            grid=(B // tm,),
            in_specs=[
                pl.BlockSpec((tm, in_dim), lambda i: (i, 0)),  # x tile (pipelined)
                pl.BlockSpec((in_dim, hp), lambda i: (0, 0)),  # w1 (VMEM-resident)
                pl.BlockSpec((1, hp), lambda i: (0, 0)),       # b1 (VMEM-resident)
                pl.BlockSpec((hp, op), lambda i: (0, 0)),      # w2 (VMEM-resident)
                pl.BlockSpec((1, op), lambda i: (0, 0)),       # b2 (VMEM-resident)
            ],
            out_specs=pl.BlockSpec((tm, op), lambda i: (i, 0)),
        ),
        compiler_params=pltpu.CompilerParams(
            # Batch tiles are independent -> shard across both v7x TensorCores
            # when the grid has >= 2 steps; harmless no-op on v5e/v6e.
            dimension_semantics=("parallel",),
        ),
    )(x, w1p, b1p, w2p, b2p)


def init_params(key, in_dim, hidden_dim, out_dim):
    """PyTorch-style uniform(-1/sqrt(fan_in), 1/sqrt(fan_in)) init (transposed weights)."""
    k1, k2, k3, k4 = jax.random.split(key, 4)
    bound1 = 1.0 / jnp.sqrt(in_dim)
    bound2 = 1.0 / jnp.sqrt(hidden_dim)
    w1 = jax.random.uniform(k1, (in_dim, hidden_dim), jnp.float32, -bound1, bound1)
    b1 = jax.random.uniform(k2, (1, hidden_dim), jnp.float32, -bound1, bound1)
    w2 = jax.random.uniform(k3, (hidden_dim, out_dim), jnp.float32, -bound2, bound2)
    b2 = jax.random.uniform(k4, (1, out_dim), jnp.float32, -bound2, bound2)
    return w1, b1, w2, b2


if __name__ == "__main__":
    # CartPole DQN: layer_sizes = [4, 64, 2].  Replay-buffer-sized batch (256)
    # so the batch tiling / grid choice is actually exercised.
    batch, in_dim, hidden_dim, out_dim = 256, 4, 64, 2

    key = jax.random.PRNGKey(0)
    kx, kp = jax.random.split(key)
    x = jax.random.normal(kx, (batch, in_dim), jnp.float32)
    w1, b1, w2, b2 = init_params(kp, in_dim, hidden_dim, out_dim)

    # Pad ONCE at init; the hot-path forward reuses these padded params.
    w1p, b1p, w2p, b2p = jax.block_until_ready(pad_params(w1, b1, w2, b2))

    tm = choose_tm(batch)  # 256 (1 step) on v5e/v6e, 128 (2 steps) on v7x

    out_padded = dqn_forward_padded(x, w1p, b1p, w2p, b2p, tm=tm)
    out_padded = jax.block_until_ready(out_padded)

    # Pure-JAX reference of the same forward semantics.
    ref = jnp.tanh(x @ w1 + b1) @ w2 + b2
    out = out_padded[:, :out_dim]  # slice only for the check, outside the forward
    assert out.shape == (batch, out_dim)
    assert jnp.allclose(out, ref, atol=1e-5, rtol=1e-5)
    # Padded Q-value columns are exactly zero, so masking downstream is safe.
    assert bool(jnp.all(out_padded[:, out_dim:] == 0.0))

    print("KERNEL_OK")
</pallas_src>

<mosaic_0001>
module attributes {stable_mosaic.version = 11 : i64} {
  func.func @dqn_kernel(%arg0: i32, %arg1: memref<256x4xf32, #tpu.memory_space<vmem>>, %arg2: memref<4x128xf32, #tpu.memory_space<vmem>>, %arg3: memref<1x128xf32, #tpu.memory_space<vmem>>, %arg4: memref<128x128xf32, #tpu.memory_space<vmem>>, %arg5: memref<1x128xf32, #tpu.memory_space<vmem>>, %arg6: memref<256x128xf32, #tpu.memory_space<vmem>>) attributes {dimension_semantics = [#tpu.dimension_semantics<parallel>], iteration_bounds = array<i64: 1>, scalar_prefetch = 0 : i64, scratch_operands = 0 : i64, tpu.core_type = #tpu.core_type<tc>, window_params = [{transform_indices = @transform_0, window_bounds = array<i64: 256, 4>}, {pipeline_mode = #tpu.pipeline_mode<synchronous>, transform_indices = @transform_1, window_bounds = array<i64: 4, 128>}, {pipeline_mode = #tpu.pipeline_mode<synchronous>, transform_indices = @transform_2, window_bounds = array<i64: 1, 128>}, {pipeline_mode = #tpu.pipeline_mode<synchronous>, transform_indices = @transform_3, window_bounds = array<i64: 128, 128>}, {pipeline_mode = #tpu.pipeline_mode<synchronous>, transform_indices = @transform_4, window_bounds = array<i64: 1, 128>}, {transform_indices = @transform_5, window_bounds = array<i64: 256, 128>}]} {
    %c0 = arith.constant 0 : index
    %c0_0 = arith.constant 0 : index
    %0 = vector.load %arg1[%c0, %c0_0] : memref<256x4xf32, #tpu.memory_space<vmem>>, vector<256x4xf32>
    %c0_1 = arith.constant 0 : index
    %c0_2 = arith.constant 0 : index
    %1 = vector.load %arg2[%c0_1, %c0_2] : memref<4x128xf32, #tpu.memory_space<vmem>>, vector<4x128xf32>
    %cst = arith.constant dense<0.000000e+00> : vector<256x128xf32>
    %2 = tpu.matmul %0, %1, %cst {dimension_numbers = #tpu.dot_dimension_numbers<[1], [0], [0], [1], [0, 0, 1, 1], [], []>} : vector<256x4xf32>, vector<4x128xf32>, vector<256x128xf32> -> vector<256x128xf32>
    %c0_3 = arith.constant 0 : index
    %c0_4 = arith.constant 0 : index
    %3 = vector.load %arg3[%c0_3, %c0_4] : memref<1x128xf32, #tpu.memory_space<vmem>>, vector<1x128xf32>
    %4 = vector.broadcast %3 : vector<1x128xf32> to vector<256x128xf32>
    %5 = arith.addf %2, %4 : vector<256x128xf32>
    %6 = math.tanh %5 : vector<256x128xf32>
    %c0_5 = arith.constant 0 : index
    %c0_6 = arith.constant 0 : index
    %7 = vector.load %arg4[%c0_5, %c0_6] : memref<128x128xf32, #tpu.memory_space<vmem>>, vector<128x128xf32>
    %cst_7 = arith.constant dense<0.000000e+00> : vector<256x128xf32>
    %8 = tpu.matmul %6, %7, %cst_7 {dimension_numbers = #tpu.dot_dimension_numbers<[1], [0], [0], [1], [0, 0, 1, 1], [], []>} : vector<256x128xf32>, vector<128x128xf32>, vector<256x128xf32> -> vector<256x128xf32>
    %c0_8 = arith.constant 0 : index
    %c0_9 = arith.constant 0 : index
    %9 = vector.load %arg5[%c0_8, %c0_9] : memref<1x128xf32, #tpu.memory_space<vmem>>, vector<1x128xf32>
    %10 = vector.broadcast %9 : vector<1x128xf32> to vector<256x128xf32>
    %11 = arith.addf %8, %10 : vector<256x128xf32>
    %c0_10 = arith.constant 0 : index
    %c0_11 = arith.constant 0 : index
    %12 = vector.load %arg6[%c0_10, %c0_11] : memref<256x128xf32, #tpu.memory_space<vmem>>, vector<256x128xf32>
    tpu.vector_store %arg6[%c0_10, %c0_11], %11 {strides = array<i32>} : memref<256x128xf32, #tpu.memory_space<vmem>>, vector<256x128xf32>,
    return
  }
  func.func @transform_0(%arg0: i32) -> (i32, i32) {
    %c0_i32 = arith.constant 0 : i32
    %c0_i32_0 = arith.constant 0 : i32
    return %arg0, %c0_i32 : i32, i32
  }
  func.func @transform_1(%arg0: i32) -> (i32, i32) {
    %c0_i32 = arith.constant 0 : i32
    %c0_i32_0 = arith.constant 0 : i32
    %c0_i32_1 = arith.constant 0 : i32
    return %c0_i32, %c0_i32_0 : i32, i32
  }
  func.func @transform_2(%arg0: i32) -> (i32, i32) {
    %c0_i32 = arith.constant 0 : i32
    %c0_i32_0 = arith.constant 0 : i32
    %c0_i32_1 = arith.constant 0 : i32
    return %c0_i32, %c0_i32_0 : i32, i32
  }
  func.func @transform_3(%arg0: i32) -> (i32, i32) {
    %c0_i32 = arith.constant 0 : i32
    %c0_i32_0 = arith.constant 0 : i32
    %c0_i32_1 = arith.constant 0 : i32
    return %c0_i32, %c0_i32_0 : i32, i32
  }
  func.func @transform_4(%arg0: i32) -> (i32, i32) {
    %c0_i32 = arith.constant 0 : i32
    %c0_i32_0 = arith.constant 0 : i32
    %c0_i32_1 = arith.constant 0 : i32
    return %c0_i32, %c0_i32_0 : i32, i32
  }
  func.func @transform_5(%arg0: i32) -> (i32, i32) {
    %c0_i32 = arith.constant 0 : i32
    %c0_i32_0 = arith.constant 0 : i32
    return %arg0, %c0_i32 : i32, i32
  }
}

</mosaic_0001>

<bundles_post_ra>
// kernel: dqn_forward_padded.1
= control target key start
LH: loop header
LB: loop body
LE: loop exit
PB: predicated region body
PF: predicated region fallthrough
CT: control target
= control target key end

     0   :  { %vm155_vm0 = vcmask 1043456   ;;  %vm58_vm1 = vcmask 31744   ;;  %s946_s0 = inlined_call_operand.vmem [shape: f32[256,4], index: 0, kind: input, shape index: {}]   ;;  %s947_s1 = inlined_call_operand.vmem [shape: f32[4,128], index: 1, kind: input, shape index: {}]   ;;  %s948_s2 = inlined_call_operand.vmem [shape: f32[1,128], index: 2, kind: input, shape index: {}]   ;;  %s949_s3 = inlined_call_operand.vmem [shape: f32[128,128], index: 3, kind: input, shape index: {}]   ;;  %s950_s4 = inlined_call_operand.vmem [shape: f32[1,128], index: 4, kind: input, shape index: {}]   ;;  %s951_s5 = inlined_call_operand.hbm [shape: f32[256,128], index: 5, kind: output, shape index: {}]  }
   0x1   :  { %v53_v0 = vld [vmem:[%s947_s1] sm:$0xf] }
   0x2   :  { %v21_v1 = vld [vmem:[%s946_s0] sm:$0xff]  ;;  %487 = vmatpush.msk.msra.mxu0 %vm155_vm0, %v53_v0  ;;  %520 = vmatpush.msk.msra.mxu3 %vm155_vm0, %v53_v0 }
   0x3   :  { %488 = vmatmul.msk.f32.vlgmr.msra.gmra.mxu0 %vm58_vm1, %v21_v1 }
   0x4   :  { %10 = vsyncpa [#allocation3], 0  ;;  %v22_v2 = vld [vmem:[%s946_s0 + $0x8] sm:$0xff]  ;;  %v23_v3 = vld [vmem:[%s946_s0 + $0x10] sm:$0xff]  ;;  %s475_s15 = sshll.u32 %s951_s5, 4  ;;  %s649_s16 = smov 128   ;;  %s476_s15 = int_to_ptr.hbm [resolvable:$true] %s475_s15 }
   0x5   :  { %v24_v4 = vld [vmem:[%s946_s0 + $0x18] sm:$0xff]  ;;  %v25_v5 = vld [vmem:[%s946_s0 + $0x20] sm:$0xff]  ;;  %v26_v6 = vld [vmem:[%s946_s0 + $0x28] sm:$0xff]  ;;  %s650_s17 = smov 8  }
   0x6   :  { %v27_v7 = vld [vmem:[%s946_s0 + $0x30] sm:$0xff]  ;;  %v28_v8 = vld [vmem:[%s946_s0 + $0x38] sm:$0xff]  ;;  %v29_v9 = vld [vmem:[%s946_s0 + $0x40] sm:$0xff] }
   0x7   :  { %v30_v10 = vld [vmem:[%s946_s0 + $0x48] sm:$0xff]  ;;  %v319_v11 = vld [vmem:[%s949_s3 + $0x78] sm:$0xff]  ;;  %v318_v12 = vld [vmem:[%s949_s3 + $0x70] sm:$0xff] }
   0x8   :  { %324 = vmatpush.msra.mxu1 %v319_v11  ;;  %v317_v13 = vld [vmem:[%s949_s3 + $0x68] sm:$0xff]  ;;  %521 = vmatpush.msra.mxu2 %v319_v11  ;;  %v316_v14 = vld [vmem:[%s949_s3 + $0x60] sm:$0xff]  ;;  %v31_v15 = vld [vmem:[%s946_s0 + $0x50] sm:$0xff] }
   0x9   :  { %522 = vmatpush.msrb.mxu3 %v319_v11  ;;  %v315_v16 = vld [vmem:[%s949_s3 + $0x58] sm:$0xff]  ;;  %v39_v17 = vld [vmem:[%s946_s0 + $0x90] sm:$0xff]  ;;  %v313_v19 = vld [vmem:[%s949_s3 + $0x48] sm:$0xff] }
   0xa   :  { %325 = vmatpush.msra.mxu1 %v318_v12  ;;  %523 = vmatpush.msra.mxu2 %v318_v12  ;;  %v314_v18 = vld [vmem:[%s949_s3 + $0x50] sm:$0xff]  ;;  %v312_v20 = vld [vmem:[%s949_s3 + $0x40] sm:$0xff]  ;;  %v32_v21 = vld [vmem:[%s946_s0 + $0x58] sm:$0xff] }
   0xb   :  { %489 = vmatmul.msk.f32.gmra.mxu0 %vm58_vm1, %v22_v2  ;;  %524 = vmatpush.msrb.mxu3 %v318_v12  ;;  %v311_v22 = vld [vmem:[%s949_s3 + $0x38] sm:$0xff]  ;;  %v310_v24 = vld [vmem:[%s949_s3 + $0x30] sm:$0xff]  ;;  %v309_v25 = vld [vmem:[%s949_s3 + $0x28] sm:$0xff] }
   0xc   :  { %326 = vmatpush.msra.mxu1 %v317_v13  ;;  %525 = vmatpush.msra.mxu2 %v317_v13  ;;  %v40_v23 = vld [vmem:[%s946_s0 + $0x98] sm:$0xff]  ;;  %v33_v26 = vld [vmem:[%s946_s0 + $0x60] sm:$0xff]  ;;  %v306_v30 = vld [vmem:[%s949_s3 + $0x10] sm:$0xff] }
   0xd   :  { %526 = vmatpush.msrb.mxu3 %v317_v13  ;;  %v308_v27 = vld [vmem:[%s949_s3 + $0x20] sm:$0xff]  ;;  %v307_v28 = vld [vmem:[%s949_s3 + $0x18] sm:$0xff]  ;;  %v305_v31 = vld [vmem:[%s949_s3 + $0x8] sm:$0xff] }
   0xe   :  { %327 = vmatpush.msra.mxu1 %v316_v14  ;;  %527 = vmatpush.msra.mxu2 %v316_v14  ;;  %v41_v29 = vld [vmem:[%s946_s0 + $0xa0] sm:$0xff]  ;;  %v34_v32 = vld [vmem:[%s946_s0 + $0x68] sm:$0xff]  ;;  %v35_v35 = vld [vmem:[%s946_s0 + $0x70] sm:$0xff] }
   0xf   :  { %528 = vmatpush.msrb.mxu3 %v316_v14  ;;  %v304_v33 = vld [vmem:[%s949_s3] sm:$0xff]  ;;  %v42_v34 = vld [vmem:[%s946_s0 + $0xa8] sm:$0xff]  ;;  %v43_v36 = vld [vmem:[%s946_s0 + $0xb0] sm:$0xff] }
  0x10   :  { %328 = vmatpush.msra.mxu1 %v315_v16  ;;  %506 = vmatmul.msk.f32.vlgmr.msra.gmra.mxu3 %vm58_vm1, %v39_v17  ;;  %v36_v37 = vld [vmem:[%s946_s0 + $0x78] sm:$0xff]  ;;  %v823_v39 = vld [vmem:[%s948_s2] ss:$0 sm:$0xff]  ;;  %v38_v45 = vld [vmem:[%s946_s0 + $0x88] sm:$0xff] }
  0x11   :  { %529 = vmatpush.msra.mxu2 %v315_v16  ;;  %530 = vmatpush.msrb.mxu3 %v315_v16  ;;  %v44_v38 = vld [vmem:[%s946_s0 + $0xb8] sm:$0xff]  ;;  %v37_v41 = vld [vmem:[%s946_s0 + $0x80] sm:$0xff]  ;;  %v46_v48 = vld [vmem:[%s946_s0 + $0xc8] sm:$0xff] }
  0x12   :  { %329 = vmatpush.msra.mxu1 %v314_v18  ;;  %v45_v43 = vld [vmem:[%s946_s0 + $0xc0] sm:$0xff]  ;;  %v47_v52 = vld [vmem:[%s946_s0 + $0xd0] sm:$0xff]  ;;  %v48_v56 = vld [vmem:[%s946_s0 + $0xd8] sm:$0xff] }
  0x13   :  { %490 = vmatmul.msk.f32.gmra.mxu0 %vm58_vm1, %v23_v3  ;;  %531 = vmatpush.msra.mxu2 %v314_v18  ;;  %v49_v60 = vld [vmem:[%s946_s0 + $0xe0] sm:$0xff]  ;;  %v50_v0 = vld [vmem:[%s946_s0 + $0xe8] sm:$0xff] }
  0x14   :  { %330 = vmatpush.msra.mxu1 %v313_v19  ;;  %532 = vmatpush.msrb.mxu3 %v314_v18 }
  0x15   :  { %533 = vmatpush.msra.mxu2 %v313_v19 }
  0x16   :  { %331 = vmatpush.msra.mxu1 %v312_v20  ;;  %534 = vmatpush.msrb.mxu3 %v313_v19 }
  0x17   :  { %535 = vmatpush.msra.mxu2 %v312_v20 }
  0x18   :  { %332 = vmatpush.msra.mxu1 %v311_v22  ;;  %507 = vmatmul.msk.f32.gmra.mxu3 %vm58_vm1, %v40_v23 }
  0x19   :  { %537 = vmatpush.msra.mxu2 %v311_v22  ;;  %536 = vmatpush.msrb.mxu3 %v312_v20 }
  0x1a   :  { %333 = vmatpush.msra.mxu1 %v310_v24 }
  0x1b   :  { %491 = vmatmul.msk.f32.gmra.mxu0 %vm58_vm1, %v24_v4  ;;  %539 = vmatpush.msra.mxu2 %v310_v24  ;;  %v51_v4 = vld [vmem:[%s946_s0 + $0xf0] sm:$0xff] }
  0x1c   :  { %334 = vmatpush.msra.mxu1 %v309_v25  ;;  %538 = vmatpush.msrb.mxu3 %v311_v22 }
  0x1d   :  { %541 = vmatpush.msra.mxu2 %v309_v25 }
  0x1e   :  { %335 = vmatpush.msra.mxu1 %v308_v27  ;;  %540 = vmatpush.msrb.mxu3 %v310_v24 }
  0x1f   :  { %543 = vmatpush.msra.mxu2 %v308_v27 }
  0x20   :  { %336 = vmatpush.msra.mxu1 %v307_v28  ;;  %508 = vmatmul.msk.f32.gmra.mxu3 %vm58_vm1, %v41_v29 }
  0x21   :  { %545 = vmatpush.msra.mxu2 %v307_v28  ;;  %542 = vmatpush.msrb.mxu3 %v309_v25 }
  0x22   :  { %337 = vmatpush.msra.mxu1 %v306_v30 }
  0x23   :  { %492 = vmatmul.msk.f32.gmra.mxu0 %vm58_vm1, %v25_v5  ;;  %547 = vmatpush.msra.mxu2 %v306_v30 }
  0x24   :  { %338 = vmatpush.msra.mxu1 %v305_v31  ;;  %544 = vmatpush.msrb.mxu3 %v308_v27 }
  0x25   :  { %549 = vmatpush.msra.mxu2 %v305_v31 }
  0x26   :  { %339 = vmatpush.msra.mxu1 %v304_v33  ;;  %546 = vmatpush.msrb.mxu3 %v307_v28 }
  0x27   :  { %551 = vmatpush.msra.mxu2 %v304_v33 }
  0x28   :  { %548 = vmatpush.msrb.mxu3 %v306_v30 }
  0x29   :  { %509 = vmatmul.msk.f32.gmra.mxu3 %vm58_vm1, %v42_v34 }
  0x2a   :  { %550 = vmatpush.msrb.mxu3 %v305_v31 }
  0x2b   :  { %493 = vmatmul.msk.f32.gmra.mxu0 %vm58_vm1, %v26_v6 }
  0x2c   :  { %552 = vmatpush.msrb.mxu3 %v304_v33 }
  0x31   :  { %510 = vmatmul.msk.f32.gmra.mxu3 %vm58_vm1, %v43_v36 }
  0x33   :  { %494 = vmatmul.msk.f32.gmra.mxu0 %vm58_vm1, %v27_v7 }
  0x39   :  { %511 = vmatmul.msk.f32.gmra.mxu3 %vm58_vm1, %v44_v38 }
  0x3b   :  { %495 = vmatmul.msk.f32.gmra.mxu0 %vm58_vm1, %v28_v8  ;;  %v52_v8 = vld [vmem:[%s946_s0 + $0xf8] sm:$0xff] }
  0x41   :  { %512 = vmatmul.msk.f32.gmra.mxu3 %vm58_vm1, %v45_v43  ;;  %v885_v43 = vld [vmem:[%s950_s4] ss:$0 sm:$0xff]  ;;  %s648_s4 = smov [#allocation2]  }
  0x42   :  { %s473_s12 = sshll.u32 %s648_s4, 4  ;;  %s474_s12 = int_to_ptr.vmem [resolvable:$true] %s473_s12 }
  0x43   :  { %496 = vmatmul.msk.f32.gmra.mxu0 %vm58_vm1, %v29_v9 }
  0x49   :  { %513 = vmatmul.msk.f32.gmra.mxu3 %vm58_vm1, %v46_v48 }
  0x4b   :  { %497 = vmatmul.msk.f32.gmra.mxu0 %vm58_vm1, %v30_v10 }
  0x51   :  { %514 = vmatmul.msk.f32.gmra.mxu3 %vm58_vm1, %v47_v52 }
  0x53   :  { %498 = vmatmul.msk.f32.gmra.mxu0 %vm58_vm1, %v31_v15 }
  0x59   :  { %515 = vmatmul.msk.f32.gmra.mxu3 %vm58_vm1, %v48_v56 }
  0x5b   :  { %499 = vmatmul.msk.f32.gmra.mxu0 %vm58_vm1, %v32_v21 }
  0x61   :  { %516 = vmatmul.msk.f32.gmra.mxu3 %vm58_vm1, %v49_v60 }
  0x63   :  { %500 = vmatmul.msk.f32.gmra.mxu0 %vm58_vm1, %v33_v26 }
  0x69   :  { %517 = vmatmul.msk.f32.gmra.mxu3 %vm58_vm1, %v50_v0 }
  0x6b   :  { %501 = vmatmul.msk.f32.gmra.mxu0 %vm58_vm1, %v34_v32 }
  0x71   :  { %518 = vmatmul.msk.f32.gmra.mxu3 %vm58_vm1, %v51_v4 }
  0x73   :  { %502 = vmatmul.msk.f32.gmra.mxu0 %vm58_vm1, %v35_v35 }
  0x79   :  { %519 = vmatmul.msk.f32.gmra.mxu3 %vm58_vm1, %v52_v8 }
  0x7b   :  { %503 = vmatmul.msk.f32.gmra.mxu0 %vm58_vm1, %v36_v37 }
  0x80   :  { %v176_v40 = vpop.f32.mrf.mxu0 }
  0x81   :  { %v177_v42 = vadd.f32 %v823_v39, %v176_v40 }
  0x83   :  { %558 = vtanh.f32 %v177_v42  ;;  %504 = vmatmul.msk.f32.gmra.mxu0 %vm58_vm1, %v37_v41 }
  0x88   :  { %v179_v44 = vpop.f32.mrf.mxu0 }
  0x89   :  { %v559_v46 = vpop.eup %558  ;;  %v180_v47 = vadd.f32 %v823_v39, %v179_v44 }
  0x8a   :  { %340 = vmatmul.f32.vlgmr.msra.gmra.mxu1 %v559_v46 }
  0x8b   :  { %560 = vtanh.f32 %v180_v47  ;;  %505 = vmatmul.msk.f32.gmra.mxu0 %vm58_vm1, %v38_v45 }
  0x90   :  { %v182_v49 = vpop.f32.mrf.mxu0 }
  0x91   :  { %v561_v50 = vpop.eup %560  ;;  %v183_v51 = vadd.f32 %v823_v39, %v182_v49 }
  0x92   :  { %343 = vmatmul.f32.gmra.mxu1 %v561_v50 }
  0x93   :  { %562 = vtanh.f32 %v183_v51  ;;  %v230_v19 = vpop.f32.mrf.mxu3 }
  0x94   :  { %v231_v50 = vadd.f32 %v823_v39, %v230_v19 }
  0x98   :  { %v185_v53 = vpop.f32.mrf.mxu0 }
  0x99   :  { %v563_v54 = vpop.eup %562  ;;  %v186_v55 = vadd.f32 %v823_v39, %v185_v53 }
  0x9a   :  { %346 = vmatmul.f32.gmra.mxu1 %v563_v54 }
  0x9b   :  { %564 = vtanh.f32 %v186_v55  ;;  %v233_v23 = vpop.f32.mrf.mxu3 }
  0x9c   :  { %v234_v55 = vadd.f32 %v823_v39, %v233_v23 }
  0xa0   :  { %v188_v57 = vpop.f32.mrf.mxu0 }
  0xa1   :  { %v565_v58 = vpop.eup %564  ;;  %v189_v59 = vadd.f32 %v823_v39, %v188_v57 }
  0xa2   :  { %349 = vmatmul.f32.gmra.mxu1 %v565_v58 }
  0xa3   :  { %566 = vtanh.f32 %v189_v59  ;;  %v236_v27 = vpop.f32.mrf.mxu3 }
  0xa4   :  { %v237_v60 = vadd.f32 %v823_v39, %v236_v27 }
  0xa8   :  { %v191_v61 = vpop.f32.mrf.mxu0 }
  0xa9   :  { %v567_v62 = vpop.eup %566  ;;  %v192_v63 = vadd.f32 %v823_v39, %v191_v61 }
  0xaa   :  { %352 = vmatmul.f32.gmra.mxu1 %v567_v62 }
  0xab   :  { %568 = vtanh.f32 %v192_v63 }
  0xac   :  { %v239_v31 = vpop.f32.mrf.mxu3 }
  0xb0   :  { %v194_v1 = vpop.f32.mrf.mxu0 }
  0xb1   :  { %v569_v2 = vpop.eup %568  ;;  %v195_v3 = vadd.f32 %v823_v39, %v194_v1  ;;  %v240_v1 = vadd.f32 %v823_v39, %v239_v31 }
  0xb2   :  { %355 = vmatmul.f32.gmra.mxu1 %v569_v2 }
  0xb3   :  { %570 = vtanh.f32 %v195_v3 }
  0xb4   :  { %v242_v35 = vpop.f32.mrf.mxu3 }
  0xb8   :  { %v197_v5 = vpop.f32.mrf.mxu0 }
  0xb9   :  { %v571_v6 = vpop.eup %570  ;;  %v198_v7 = vadd.f32 %v823_v39, %v197_v5 }
  0xba   :  { %358 = vmatmul.f32.gmra.mxu1 %v571_v6  ;;  %v243_v6 = vadd.f32 %v823_v39, %v242_v35 }
  0xbb   :  { %572 = vtanh.f32 %v198_v7 }
  0xbc   :  { %v245_v40 = vpop.f32.mrf.mxu3 }
  0xc0   :  { %v200_v9 = vpop.f32.mrf.mxu0 }
  0xc1   :  { %v573_v10 = vpop.eup %572  ;;  %v201_v11 = vadd.f32 %v823_v39, %v200_v9 }
  0xc2   :  { %361 = vmatmul.f32.gmra.mxu1 %v573_v10 }
  0xc3   :  { %574 = vtanh.f32 %v201_v11 }
  0xc4   :  { %v248_v47 = vpop.f32.mrf.mxu3 }
  0xc5   :  { %v249_v19 = vadd.f32 %v823_v39, %v248_v47 }
  0xc8   :  { %v203_v12 = vpop.f32.mrf.mxu0 }
  0xc9   :  { %v575_v13 = vpop.eup %574  ;;  %v204_v14 = vadd.f32 %v823_v39, %v203_v12  ;;  %v246_v12 = vadd.f32 %v823_v39, %v245_v40 }
  0xca   :  { %364 = vmatmul.f32.gmra.mxu1 %v575_v13 }
  0xcb   :  { %576 = vtanh.f32 %v204_v14 }
  0xcc   :  { %v891_v53 = vpop.f32.mrf.mxu3 }
  0xd0   :  { %v206_v15 = vpop.f32.mrf.mxu0 }
  0xd1   :  { %v577_v16 = vpop.eup %576  ;;  %v207_v17 = vadd.f32 %v823_v39, %v206_v15 }
  0xd2   :  { %367 = vmatmul.f32.gmra.mxu1 %v577_v16 }
  0xd3   :  { %578 = vtanh.f32 %v207_v17 }
  0xd4   :  { %v895_v58 = vpop.f32.mrf.mxu3 }
  0xd5   :  { %v255_v31 = vadd.f32 %v823_v39, %v895_v58 }
  0xd8   :  { %v209_v18 = vpop.f32.mrf.mxu0 }
  0xd9   :  { %v579_v20 = vpop.eup %578  ;;  %v210_v21 = vadd.f32 %v823_v39, %v209_v18 }
  0xda   :  { %370 = vmatmul.f32.gmra.mxu1 %v579_v20 }
  0xdb   :  { %580 = vtanh.f32 %v210_v21 }
  0xdc   :  { %v899_v63 = vpop.f32.mrf.mxu3 }
  0xdd   :  { %v258_v35 = vadd.f32 %v823_v39, %v899_v63 }
  0xe0   :  { %v212_v22 = vpop.f32.mrf.mxu0 }
  0xe1   :  { %v581_v24 = vpop.eup %580  ;;  %v213_v25 = vadd.f32 %v823_v39, %v212_v22 }
  0xe2   :  { %373 = vmatmul.f32.gmra.mxu1 %v581_v24 }
  0xe3   :  { %582 = vtanh.f32 %v213_v25 }
  0xe4   :  { %v260_v4 = vpop.f32.mrf.mxu3 }
  0xe5   :  { %v261_v40 = vadd.f32 %v823_v39, %v260_v4 }
  0xe8   :  { %v215_v26 = vpop.f32.mrf.mxu0 }
  0xe9   :  { %v583_v28 = vpop.eup %582  ;;  %v216_v29 = vadd.f32 %v823_v39, %v215_v26  ;;  %v252_v26 = vadd.f32 %v823_v39, %v891_v53 }
  0xea   :  { %376 = vmatmul.f32.gmra.mxu1 %v583_v28 }
  0xeb   :  { %584 = vtanh.f32 %v216_v29 }
  0xec   :  { %v263_v9 = vpop.f32.mrf.mxu3 }
  0xed   :  { %v264_v11 = vadd.f32 %v823_v39, %v263_v9 }
  0xf0   :  { %v218_v30 = vpop.f32.mrf.mxu0 }
  0xf1   :  { %v585_v32 = vpop.eup %584  ;;  %v219_v33 = vadd.f32 %v823_v39, %v218_v30 }
  0xf2   :  { %379 = vmatmul.f32.gmra.mxu1 %v585_v32 }
  0xf3   :  { %586 = vtanh.f32 %v219_v33 }
  0xf4   :  { %v266_v16 = vpop.f32.mrf.mxu3 }
  0xf5   :  { %v267_v18 = vadd.f32 %v823_v39, %v266_v16 }
  0xf8   :  { %v221_v34 = vpop.f32.mrf.mxu0 }
  0xf9   :  { %v587_v36 = vpop.eup %586  ;;  %v222_v37 = vadd.f32 %v823_v39, %v221_v34 }
  0xfa   :  { %382 = vmatmul.f32.vlgmr.msra.gmra.mxu2 %v587_v36 }
  0xfb   :  { %588 = vtanh.f32 %v222_v37 }
  0xfc   :  { %v269_v23 = vpop.f32.mrf.mxu3 }
  0xfd   :  { %v270_v25 = vadd.f32 %v823_v39, %v269_v23 }
 0x100   :  { %v224_v38 = vpop.f32.mrf.mxu0 }
 0x101   :  { %v589_v41 = vpop.eup %588  ;;  %v225_v42 = vadd.f32 %v823_v39, %v224_v38 }
 0x102   :  { %385 = vmatmul.f32.gmra.mxu2 %v589_v41 }
 0x103   :  { %590 = vtanh.f32 %v225_v42 }
 0x107   :  { %v341_v44 = vpop.f32.mrf.mxu1 }
 0x108   :  { %v342_v45 = vadd.f32 %v885_v43, %v341_v44  ;;  %v227_v46 = vpop.f32.mrf.mxu0 }
 0x109   :  { %v591_v48 = vpop.eup %590  ;;  %v228_v49 = vadd.f32 %v823_v39, %v227_v46 }
 0x10a   :  { %437 = vst [vmem:[#allocation2] sm:$0xff] %v342_v45  ;;  %388 = vmatmul.f32.gmra.mxu2 %v591_v48 }
 0x10b   :  { %592 = vtanh.f32 %v228_v49 }
 0x10c   :  { %594 = vtanh.f32 %v231_v50 }
 0x10d   :  { %596 = vtanh.f32 %v234_v55 }
 0x10e   :  { %598 = vtanh.f32 %v237_v60 }
 0x10f   :  { %v344_v51 = vpop.f32.mrf.mxu1  ;;  %600 = vtanh.f32 %v240_v1 }
 0x110   :  { %v345_v52 = vadd.f32 %v885_v43, %v344_v51  ;;  %602 = vtanh.f32 %v243_v6 }
 0x111   :  { %v593_v54 = vpop.eup %592  ;;  %604 = vtanh.f32 %v264_v11 }
 0x112   :  { %438 = vst [vmem:[#allocation2 + $0x8] sm:$0xff] %v345_v52  ;;  %391 = vmatmul.f32.gmra.mxu2 %v593_v54  ;;  %v595_v59 = vpop.eup %594  ;;  %606 = vtanh.f32 %v246_v12 }
 0x113   :  { %v597_v0 = vpop.eup %596  ;;  %608 = vtanh.f32 %v267_v18 }
 0x114   :  { %v599_v5 = vpop.eup %598  ;;  %610 = vtanh.f32 %v249_v19 }
 0x115   :  { %v601_v10 = vpop.eup %600  ;;  %612 = vtanh.f32 %v270_v25 }
 0x116   :  { %v603_v14 = vpop.eup %602  ;;  %614 = vtanh.f32 %v252_v26 }
 0x117   :  { %v347_v56 = vpop.f32.mrf.mxu1  ;;  %v605_v17 = vpop.eup %604  ;;  %616 = vtanh.f32 %v255_v31 }
 0x118   :  { %v348_v57 = vadd.f32 %v885_v43, %v347_v56  ;;  %427 = vmatmul.f32.vlgmr.msrb.gmra.mxu3 %v605_v17  ;;  %v607_v21 = vpop.eup %606  ;;  %618 = vtanh.f32 %v258_v35 }
 0x119   :  { %v609_v24 = vpop.eup %608  ;;  %620 = vtanh.f32 %v261_v40 }
 0x11a   :  { %439 = vst [vmem:[#allocation2 + $0x10] sm:$0xff] %v348_v57  ;;  %394 = vmatmul.f32.gmra.mxu2 %v595_v59  ;;  %v611_v28 = vpop.eup %610 }
 0x11b   :  { %v613_v30 = vpop.eup %612 }
 0x11c   :  { %v615_v34 = vpop.eup %614 }
 0x11d   :  { %v617_v38 = vpop.eup %616 }
 0x11e   :  { %v619_v44 = vpop.eup %618 }
 0x11f   :  { %v350_v61 = vpop.f32.mrf.mxu1  ;;  %v621_v47 = vpop.eup %620 }
 0x120   :  { %v351_v62 = vadd.f32 %v885_v43, %v350_v61  ;;  %430 = vmatmul.f32.gmra.mxu3 %v609_v24 }
 0x122   :  { %440 = vst [vmem:[#allocation2 + $0x18] sm:$0xff] %v351_v62  ;;  %397 = vmatmul.f32.gmra.mxu2 %v597_v0 }
 0x127   :  { %v353_v2 = vpop.f32.mrf.mxu1 }
 0x128   :  { %v354_v3 = vadd.f32 %v885_v43, %v353_v2  ;;  %433 = vmatmul.f32.gmra.mxu3 %v613_v30 }
 0x12a   :  { %441 = vst [vmem:[#allocation2 + $0x20] sm:$0xff] %v354_v3  ;;  %400 = vmatmul.f32.gmra.mxu2 %v599_v5 }
 0x12f   :  { %v356_v7 = vpop.f32.mrf.mxu1 }
 0x130   :  { %v357_v8 = vadd.f32 %v885_v43, %v356_v7 }
 0x132   :  { %442 = vst [vmem:[#allocation2 + $0x28] sm:$0xff] %v357_v8  ;;  %403 = vmatmul.f32.gmra.mxu2 %v601_v10 }
 0x137   :  { %v359_v13 = vpop.f32.mrf.mxu1 }
 0x138   :  { %v360_v15 = vadd.f32 %v885_v43, %v359_v13 }
 0x13a   :  { %443 = vst [vmem:[#allocation2 + $0x30] sm:$0xff] %v360_v15  ;;  %406 = vmatmul.f32.gmra.mxu2 %v603_v14 }
 0x13f   :  { %v362_v20 = vpop.f32.mrf.mxu1 }
 0x140   :  { %v363_v22 = vadd.f32 %v885_v43, %v362_v20 }
 0x142   :  { %444 = vst [vmem:[#allocation2 + $0x38] sm:$0xff] %v363_v22  ;;  %409 = vmatmul.f32.gmra.mxu2 %v607_v21 }
 0x147   :  { %v365_v27 = vpop.f32.mrf.mxu1 }
 0x148   :  { %v366_v29 = vadd.f32 %v885_v43, %v365_v27 }
 0x14a   :  { %445 = vst [vmem:[#allocation2 + $0x40] sm:$0xff] %v366_v29  ;;  %412 = vmatmul.f32.gmra.mxu2 %v611_v28 }
 0x14f   :  { %v368_v32 = vpop.f32.mrf.mxu1 }
 0x150   :  { %v369_v33 = vadd.f32 %v885_v43, %v368_v32 }
 0x152   :  { %446 = vst [vmem:[#allocation2 + $0x48] sm:$0xff] %v369_v33  ;;  %415 = vmatmul.f32.gmra.mxu2 %v615_v34 }
 0x157   :  { %v371_v36 = vpop.f32.mrf.mxu1 }
 0x158   :  { %v372_v37 = vadd.f32 %v885_v43, %v371_v36 }
 0x15a   :  { %447 = vst [vmem:[#allocation2 + $0x50] sm:$0xff] %v372_v37  ;;  %418 = vmatmul.f32.gmra.mxu2 %v617_v38 }
 0x15f   :  { %v374_v41 = vpop.f32.mrf.mxu1 }
 0x160   :  { %v375_v42 = vadd.f32 %v885_v43, %v374_v41 }
 0x162   :  { %448 = vst [vmem:[#allocation2 + $0x58] sm:$0xff] %v375_v42  ;;  %421 = vmatmul.f32.gmra.mxu2 %v619_v44 }
 0x167   :  { %v377_v45 = vpop.f32.mrf.mxu1 }
 0x168   :  { %v378_v46 = vadd.f32 %v885_v43, %v377_v45 }
 0x16a   :  { %449 = vst [vmem:[#allocation2 + $0x60] sm:$0xff] %v378_v46  ;;  %424 = vmatmul.f32.gmra.mxu2 %v621_v47 }
 0x16f   :  { %v380_v48 = vpop.f32.mrf.mxu1 }
 0x170   :  { %v381_v49 = vadd.f32 %v885_v43, %v380_v48 }
 0x172   :  { %450 = vst [vmem:[#allocation2 + $0x68] sm:$0xff] %v381_v49 }
 0x17d   :  { %v383_v50 = vpop.f32.mrf.mxu2 }
 0x17e   :  { %v384_v39 = vadd.f32 %v885_v43, %v383_v50 }
 0x180   :  { %451 = vst [vmem:[#allocation2 + $0x70] sm:$0xff] %v384_v39 }
 0x185   :  { %v386_v51 = vpop.f32.mrf.mxu2 }
 0x186   :  { %v387_v52 = vadd.f32 %v885_v43, %v386_v51 }
 0x188   :  { %452 = vst [vmem:[#allocation2 + $0x78] sm:$0xff] %v387_v52 }
 0x18d   :  { %v389_v53 = vpop.f32.mrf.mxu2 }
 0x18e   :  { %v390_v54 = vadd.f32 %v885_v43, %v389_v53 }
 0x190   :  { %453 = vst [vmem:[#allocation2 + $0x80] sm:$0xff] %v390_v54 }
 0x195   :  { %v392_v55 = vpop.f32.mrf.mxu2 }
 0x196   :  { %v393_v56 = vadd.f32 %v885_v43, %v392_v55 }
 0x198   :  { %454 = vst [vmem:[#allocation2 + $0x88] sm:$0xff] %v393_v56 }
 0x19b   :  { %v428_v2 = vpop.f32.mrf.mxu3 }
 0x19c   :  { %v429_v4 = vadd.f32 %v885_v43, %v428_v2 }
 0x19d   :  { %v395_v57 = vpop.f32.mrf.mxu2 }
 0x19e   :  { %v396_v58 = vadd.f32 %v885_v43, %v395_v57  ;;  %466 = vst [vmem:[#allocation2 + $0xe8] sm:$0xff] %v429_v4 }
 0x1a0   :  { %455 = vst [vmem:[#allocation2 + $0x90] sm:$0xff] %v396_v58 }
 0x1a3   :  { %v431_v6 = vpop.f32.mrf.mxu3 }
 0x1a4   :  { %v432_v8 = vadd.f32 %v885_v43, %v431_v6 }
 0x1a5   :  { %v398_v59 = vpop.f32.mrf.mxu2 }
 0x1a6   :  { %v399_v60 = vadd.f32 %v885_v43, %v398_v59  ;;  %467 = vst [vmem:[#allocation2 + $0xf0] sm:$0xff] %v432_v8 }
 0x1a8   :  { %456 = vst [vmem:[#allocation2 + $0x98] sm:$0xff] %v399_v60 }
 0x1ab   :  { %v434_v10 = vpop.f32.mrf.mxu3 }
 0x1ac   :  { %v435_v12 = vadd.f32 %v885_v43, %v434_v10 }
 0x1ad   :  { %v401_v61 = vpop.f32.mrf.mxu2 }
 0x1ae   :  { %v402_v62 = vadd.f32 %v885_v43, %v401_v61  ;;  %468 = vst [vmem:[#allocation2 + $0xf8] sm:$0xff] %v435_v12 }
 0x1b0   :  { %457 = vst [vmem:[#allocation2 + $0xa0] sm:$0xff] %v402_v62 }
 0x1b5   :  { %v404_v63 = vpop.f32.mrf.mxu2 }
 0x1b6   :  { %v405_v0 = vadd.f32 %v885_v43, %v404_v63 }
 0x1b8   :  { %458 = vst [vmem:[#allocation2 + $0xa8] sm:$0xff] %v405_v0 }
 0x1bd   :  { %v407_v1 = vpop.f32.mrf.mxu2 }
 0x1be   :  { %v408_v3 = vadd.f32 %v885_v43, %v407_v1 }
 0x1c0   :  { %459 = vst [vmem:[#allocation2 + $0xb0] sm:$0xff] %v408_v3 }
 0x1c5   :  { %v410_v5 = vpop.f32.mrf.mxu2 }
 0x1c6   :  { %v411_v7 = vadd.f32 %v885_v43, %v410_v5 }
 0x1c8   :  { %460 = vst [vmem:[#allocation2 + $0xb8] sm:$0xff] %v411_v7 }
 0x1cd   :  { %v413_v9 = vpop.f32.mrf.mxu2 }
 0x1ce   :  { %v414_v11 = vadd.f32 %v885_v43, %v413_v9 }
 0x1d0   :  { %461 = vst [vmem:[#allocation2 + $0xc0] sm:$0xff] %v414_v11 }
 0x1d5   :  { %v416_v13 = vpop.f32.mrf.mxu2 }
 0x1d6   :  { %v417_v14 = vadd.f32 %v885_v43, %v416_v13 }
 0x1d8   :  { %462 = vst [vmem:[#allocation2 + $0xc8] sm:$0xff] %v417_v14 }
 0x1dd   :  { %v419_v15 = vpop.f32.mrf.mxu2 }
 0x1de   :  { %v420_v16 = vadd.f32 %v885_v43, %v419_v15 }
 0x1e0   :  { %463 = vst [vmem:[#allocation2 + $0xd0] sm:$0xff] %v420_v16 }
 0x1e5   :  { %v422_v17 = vpop.f32.mrf.mxu2 }
 0x1e6   :  { %v423_v18 = vadd.f32 %v885_v43, %v422_v17 }
 0x1e8   :  { %464 = vst [vmem:[#allocation2 + $0xd8] sm:$0xff] %v423_v18 }
 0x1ed   :  { %v425_v19 = vpop.f32.mrf.mxu2 }
 0x1ee   :  { %v426_v20 = vadd.f32 %v885_v43, %v425_v19 }
 0x1f0   :  { %465 = vst [vmem:[#allocation2 + $0xe0] sm:$0xff] %v426_v20 }
 0x1f1   :  { %481 = dma.vmem_to_hbm [thread:$0]  %s474_s12, 4096, %s476_s15, [#allocation3], %s649_s16, %s649_s16, %s650_s17  }
 0x1f2   :  { %646 = dma.done.wait [#allocation3], 4096  }
 0x1f3   :  { %647 = vsyncadd [#allocation3], 4294963200 }
 0x1f4   :  { %486 = vsyncpa [#allocation3], 1 }

</bundles_post_ra>
